<compile_context>
chip_gen: v6e
topology: v6e:2x2x1
jax: 0.10.0
libtpu: 0.0.40
codegen_flags: <defaults>
</compile_context>

<pallas_src>
import math

import jax
import jax.numpy as jnp
from jax import lax
from jax.experimental import pallas as pl
from jax.experimental.pallas import tpu as pltpu


# -------------------- config (mirrors cfgs in the PyTorch module) -----------
EPSILON = 1e-8
SDM_LOGIT_SCALE = 50.0
AVG_SIM_INFO = True
NORM_EPS = 1e-12                 # F.normalize default eps
_OUT_LANES = 128                 # lane-padded scalar output slab
_LOG_EPSILON = math.log(EPSILON)  # log(eps) for mask==0 entries


def _softmax_logsoftmax(x):
    """Row softmax + log_softmax; (rows,1) exact reciprocal, not per-elem div."""
    m = jnp.max(x, axis=1, keepdims=True)
    shifted = x - m
    ex = jnp.exp(shifted)
    denom = jnp.sum(ex, axis=1, keepdims=True)
    inv = 1.0 / denom                    # TQ exact divides (not TQ*B)
    p = ex * inv
    logp = shifted - jnp.log(denom)
    return p, logp


def cmpm_kernel(imn_ref, txn_ref, s1_ref, s2_ref, mask_ref, out_ref):
    tq, _ = mask_ref.shape
    row0 = pl.multiple_of(pl.program_id(0) * tq, tq)

    # Resident, pre-normalized embeddings (constant index map -> DMA'd once).
    imn = imn_ref[...]                        # (B, D) image_norm, f32
    txn = txn_ref[...]                        # (B, D) text_norm,  f32
    imn_rows = imn_ref[pl.ds(row0, tq), :]    # (TQ, D) VMEM slice
    txn_rows = txn_ref[pl.ds(row0, tq), :]    # (TQ, D)

    mask = mask_ref[...].astype(jnp.float32)  # (TQ, B), binary {0,1}
    n1 = s1_ref[...]                          # (TQ, 1) max(||e1_row||, eps)
    n2 = s2_ref[...]                          # (TQ, 1) max(||e2_row||, eps)

    # Two MXU matmuls, contracting dim 1 of both operands (no transpose copy).
    dn = (((1,), (1,)), ((), ()))
    sim_rows = lax.dot_general(imn_rows, txn, dn,
                               preferred_element_type=jnp.float32)  # cosine sim
    t2i_sim = lax.dot_general(txn_rows, imn, dn,
                              preferred_element_type=jnp.float32)   # (TQ, B)

    # embeddings1 @ text_norm.T == ||e1_row|| * (image_norm_rows @ text_norm.T)
    image_proj_text = sim_rows * (n1 * SDM_LOGIT_SCALE)
    text_proj_image = t2i_sim * (n2 * SDM_LOGIT_SCALE)

    # log(F.normalize(mask, dim=1) + eps) for a BINARY mask:
    # positives -> 1/sqrt(row_count), negatives -> 0.
    row_pos = jnp.sum(mask, axis=1, keepdims=True)                  # (TQ, 1)
    inv_rn = lax.rsqrt(jnp.maximum(row_pos, NORM_EPS * NORM_EPS))   # (TQ, 1)
    log_pos = jnp.log(inv_rn + EPSILON)                             # TQ logs
    log_labels = jnp.where(mask > 0, log_pos, _LOG_EPSILON)         # (TQ, B)

    p_i, lp_i = _softmax_logsoftmax(image_proj_text)
    p_t, lp_t = _softmax_logsoftmax(text_proj_image)
    loss_tile = p_i * (lp_i - log_labels) + p_t * (lp_t - log_labels)
    loss_partial = jnp.sum(loss_tile)    # mean over rows applied in wrapper

    sim_sum = jnp.sum(sim_rows)
    pos_sum = jnp.sum(sim_rows * mask)
    n_pos = jnp.sum(row_pos)             # reuse (TQ,1) counts: no extra (TQ,B) reduce

    # Single lane-dense store of the 4 per-tile partial sums (lanes 0..3).
    lane = lax.broadcasted_iota(jnp.int32, (1, 8, _OUT_LANES), 2)
    out_ref[...] = (jnp.where(lane == 0, loss_partial, 0.0)
                    + jnp.where(lane == 1, sim_sum, 0.0)
                    + jnp.where(lane == 2, pos_sum, 0.0)
                    + jnp.where(lane == 3, n_pos, 0.0))


def _tpu_vmem_capacity():
    """Physical per-core VMEM bytes (conservative fallback if unqueryable)."""
    try:
        cap = getattr(pltpu.get_tpu_info(), "vmem_capacity_bytes", None)
        if cap:
            return int(cap)
    except Exception:
        pass
    return 64 << 20               # v7x per-TensorCore size: safe everywhere


def _pick_tile(B, D, budget_bytes):
    """Largest mask-friendly row tile that fits; prefer >=2 grid steps."""
    def est(t):
        resident = 2 * 2 * B * D * 4            # image_norm/text_norm, dbl-buffered
        streamed = 2 * (t * B * 1 + 2 * t * 4)  # int8 mask tile + 2 norm columns
        row_views = 2 * t * D * 4               # (TQ, D) slices of the residents
        temps = 12 * t * B * 4                  # live (TQ, B) f32 temporaries
        out = 2 * 8 * _OUT_LANES * 4
        return resident + streamed + row_views + temps + out

    # Mask is streamed as int8 -> keep TQ a multiple of 32 (its native sublane
    # tile) unless the tile covers the whole batch.
    cands = {t for t in range(32, min(B, 512) + 1, 32) if B % t == 0}
    multi = sorted((t for t in cands if t < B), reverse=True)  # >=2 grid steps
    for t in multi + [B]:
        if est(t) <= budget_bytes:
            return t, est(t)
    t = min(cands) if cands else B
    return t, est(t)


def cmpm_loss(embeddings1, embeddings2, positives_mask):
    """Returns (cmpm_loss, stat_dict) mirroring CmpmLoss.forward.

    Assumes positives_mask is a binary {0,1} mask (the usual labels-derived
    positives mask; the PyTorch module asserts its diagonal is all ones).
    """
    B, D = embeddings1.shape
    e1 = embeddings1.astype(jnp.float32)
    e2 = embeddings2.astype(jnp.float32)

    # --- hoisted normalization: tiny O(B*D) XLA op, done once ---------------
    n1 = jnp.maximum(jnp.sqrt(jnp.sum(e1 * e1, axis=1, keepdims=True)), NORM_EPS)
    n2 = jnp.maximum(jnp.sqrt(jnp.sum(e2 * e2, axis=1, keepdims=True)), NORM_EPS)
    image_norm = e1 / n1
    text_norm = e2 / n2
    mask_i8 = (positives_mask != 0).astype(jnp.int8)   # 4x less HBM traffic

    cap = _tpu_vmem_capacity()
    budget = int(cap * 0.70)
    tq, vmem_est = _pick_tile(B, D, budget)
    num_tiles = B // tq
    vmem_limit = int(min(max(vmem_est + (4 << 20), 32 << 20), cap - (8 << 20)))

    partials = pl.pallas_call(
        cmpm_kernel,
        out_shape=jax.ShapeDtypeStruct((num_tiles, 8, _OUT_LANES), jnp.float32),
        grid_spec=pltpu.PrefetchScalarGridSpec(
            num_scalar_prefetch=0,
            grid=(num_tiles,),
            in_specs=[
                pl.BlockSpec((B, D), lambda i: (0, 0)),    # image_norm (resident)
                pl.BlockSpec((B, D), lambda i: (0, 0)),    # text_norm  (resident)
                pl.BlockSpec((tq, 1), lambda i: (i, 0)),   # ||e1_row|| tile
                pl.BlockSpec((tq, 1), lambda i: (i, 0)),   # ||e2_row|| tile
                pl.BlockSpec((tq, B), lambda i: (i, 0)),   # int8 mask row tile
            ],
            out_specs=pl.BlockSpec((1, 8, _OUT_LANES), lambda i: (i, 0, 0)),
        ),
        compiler_params=pltpu.CompilerParams(
            dimension_semantics=("parallel",),
            vmem_limit_bytes=vmem_limit,
        ),
    )(image_norm, text_norm, n1, n2, mask_i8)

    # Tiny finalize over num_tiles partial sums (plain XLA, a few scalars).
    sums = jnp.sum(partials[:, 0, :4], axis=0)
    loss = sums[0] / B
    stat = {}
    if AVG_SIM_INFO:
        n_pos = sums[3]
        n_neg = B * B - n_pos
        stat["pos_avg_sim"] = sums[2] / jnp.maximum(n_pos, 1.0)
        stat["neg_avg_sim"] = (sums[1] - sums[2]) / jnp.maximum(n_neg, 1.0)
    return loss, stat


# -------------------- pure-JAX reference for validation ---------------------
def _row_l2_normalize_ref(x):
    norm = jnp.sqrt(jnp.sum(x * x, axis=1, keepdims=True))
    return x / jnp.maximum(norm, NORM_EPS)


def cmpm_loss_ref(e1, e2, mask):
    mask = mask.astype(jnp.float32)
    labels_mat_norm = _row_l2_normalize_ref(mask)
    image_norm = _row_l2_normalize_ref(e1)
    text_norm = _row_l2_normalize_ref(e2)
    ipt = e1 @ text_norm.T * SDM_LOGIT_SCALE
    tpi = e2 @ image_norm.T * SDM_LOGIT_SCALE
    log_labels = jnp.log(labels_mat_norm + EPSILON)
    p_i, lp_i = _softmax_logsoftmax(ipt)
    p_t, lp_t = _softmax_logsoftmax(tpi)
    loss = (jnp.mean(jnp.sum(p_i * (lp_i - log_labels), axis=1)) +
            jnp.mean(jnp.sum(p_t * (lp_t - log_labels), axis=1)))
    sim = image_norm @ text_norm.T
    pos = jnp.sum(sim * (mask > 0)) / jnp.sum(mask > 0)
    neg = jnp.sum(sim * (mask == 0)) / jnp.maximum(jnp.sum(mask == 0), 1)
    return loss, pos, neg


if __name__ == "__main__":
    key = jax.random.PRNGKey(0)
    k1, k2, k3 = jax.random.split(key, 3)

    B, D = 8, 32
    embeddings1 = jax.random.normal(k1, (B, D), dtype=jnp.float32)
    embeddings2 = jax.random.normal(k2, (B, D), dtype=jnp.float32)

    # Build positives_mask from labels -> diagonal is guaranteed all ones.
    labels = jax.random.randint(k3, (B,), 0, 4, dtype=jnp.int32)
    positives_mask = (labels[:, None] == labels[None, :]).astype(jnp.int32)

    # Mirror the PyTorch assertion (host-side; asserts aren't kernel ops).
    # TODO(synk): float64 mask normalization has no TPU equivalent; done in f32.
    assert bool(jnp.all(jnp.diag(positives_mask) == 1)), \
        "positives_mask diagonal is not all 1"

    loss, stat = cmpm_loss(embeddings1, embeddings2, positives_mask)
    jax.block_until_ready(loss)

    # Correctness check against pure-JAX reference.
    ref_loss, ref_pos, ref_neg = cmpm_loss_ref(
        embeddings1, embeddings2, positives_mask)
    assert jnp.allclose(loss, ref_loss, rtol=1e-4, atol=1e-5), (loss, ref_loss)
    assert jnp.allclose(stat["pos_avg_sim"], ref_pos, rtol=1e-4, atol=1e-5)
    assert jnp.allclose(stat["neg_avg_sim"], ref_neg, rtol=1e-4, atol=1e-5)

    print("KERNEL_OK")
</pallas_src>

<mosaic_0001>
module attributes {stable_mosaic.version = 11 : i64} {
  func.func @cmpm_kernel(%arg0: i32, %arg1: memref<8x32xf32, #tpu.memory_space<vmem>>, %arg2: memref<8x32xf32, #tpu.memory_space<vmem>>, %arg3: memref<8x1xf32, #tpu.memory_space<vmem>>, %arg4: memref<8x1xf32, #tpu.memory_space<vmem>>, %arg5: memref<8x8xi8, #tpu.memory_space<vmem>>, %arg6: memref<1x8x128xf32, #tpu.memory_space<vmem>>) attributes {dimension_semantics = [#tpu.dimension_semantics<parallel>], iteration_bounds = array<i64: 1>, scalar_prefetch = 0 : i64, scratch_operands = 0 : i64, tpu.core_type = #tpu.core_type<tc>, window_params = [{pipeline_mode = #tpu.pipeline_mode<synchronous>, transform_indices = @transform_0, window_bounds = array<i64: 8, 32>}, {pipeline_mode = #tpu.pipeline_mode<synchronous>, transform_indices = @transform_1, window_bounds = array<i64: 8, 32>}, {transform_indices = @transform_2, window_bounds = array<i64: 8, 1>}, {transform_indices = @transform_3, window_bounds = array<i64: 8, 1>}, {transform_indices = @transform_4, window_bounds = array<i64: 8, 8>}, {transform_indices = @transform_5, window_bounds = array<i64: 1, 8, 128>}]} {
    %c8_i32 = arith.constant 8 : i32
    %0 = arith.muli %arg0, %c8_i32 : i32
    %1 = tpu.assume_multiple %0, 8 : i32
    %c0 = arith.constant 0 : index
    %c0_0 = arith.constant 0 : index
    %2 = vector.load %arg1[%c0, %c0_0] : memref<8x32xf32, #tpu.memory_space<vmem>>, vector<8x32xf32>
    %c0_1 = arith.constant 0 : index
    %c0_2 = arith.constant 0 : index
    %3 = vector.load %arg2[%c0_1, %c0_2] : memref<8x32xf32, #tpu.memory_space<vmem>>, vector<8x32xf32>
    %4 = arith.index_cast %1 : i32 to index
    %c0_3 = arith.constant 0 : index
    %5 = vector.load %arg1[%4, %c0_3] : memref<8x32xf32, #tpu.memory_space<vmem>>, vector<8x32xf32>
    %6 = arith.index_cast %1 : i32 to index
    %c0_4 = arith.constant 0 : index
    %7 = vector.load %arg2[%6, %c0_4] : memref<8x32xf32, #tpu.memory_space<vmem>>, vector<8x32xf32>
    %c0_5 = arith.constant 0 : index
    %c0_6 = arith.constant 0 : index
    %8 = vector.load %arg5[%c0_5, %c0_6] : memref<8x8xi8, #tpu.memory_space<vmem>>, vector<8x8xi8>
    %9 = arith.sitofp %8 : vector<8x8xi8> to vector<8x8xf32>
    %c0_7 = arith.constant 0 : index
    %c0_8 = arith.constant 0 : index
    %10 = vector.load %arg3[%c0_7, %c0_8] : memref<8x1xf32, #tpu.memory_space<vmem>>, vector<8x1xf32>
    %c0_9 = arith.constant 0 : index
    %c0_10 = arith.constant 0 : index
    %11 = vector.load %arg4[%c0_9, %c0_10] : memref<8x1xf32, #tpu.memory_space<vmem>>, vector<8x1xf32>
    %cst = arith.constant dense<0.000000e+00> : vector<8x8xf32>
    %12 = tpu.matmul %5, %3, %cst {dimension_numbers = #tpu.dot_dimension_numbers<[1], [1], [0], [0], [0, 0, 1, 0], [], []>} : vector<8x32xf32>, vector<8x32xf32>, vector<8x8xf32> -> vector<8x8xf32>
    %cst_11 = arith.constant dense<0.000000e+00> : vector<8x8xf32>
    %13 = tpu.matmul %7, %2, %cst_11 {dimension_numbers = #tpu.dot_dimension_numbers<[1], [1], [0], [0], [0, 0, 1, 0], [], []>} : vector<8x32xf32>, vector<8x32xf32>, vector<8x8xf32> -> vector<8x8xf32>
    %cst_12 = arith.constant 5.000000e+01 : f32
    %14 = vector.broadcast %cst_12 : f32 to vector<8x1xf32>
    %15 = arith.mulf %10, %14 : vector<8x1xf32>
    %16 = vector.broadcast %15 : vector<8x1xf32> to vector<8x8xf32>
    %17 = arith.mulf %12, %16 : vector<8x8xf32>
    %cst_13 = arith.constant 5.000000e+01 : f32
    %18 = vector.broadcast %cst_13 : f32 to vector<8x1xf32>
    %19 = arith.mulf %11, %18 : vector<8x1xf32>
    %20 = vector.broadcast %19 : vector<8x1xf32> to vector<8x8xf32>
    %21 = arith.mulf %13, %20 : vector<8x8xf32>
    %cst_14 = arith.constant dense<0.000000e+00> : vector<8xf32>
    %22 = vector.multi_reduction <add>, %9, %cst_14 [1] : vector<8x8xf32> to vector<8xf32>
    %23 = vector.shape_cast %22 : vector<8xf32> to vector<8x1xf32>
    %cst_15 = arith.constant 1.000000e-24 : f32
    %24 = vector.broadcast %cst_15 : f32 to vector<8x1xf32>
    %25 = arith.maximumf %23, %24 : vector<8x1xf32>
    %26 = math.rsqrt %25 : vector<8x1xf32>
    %cst_16 = arith.constant 9.99999993E-9 : f32
    %27 = vector.broadcast %cst_16 : f32 to vector<8x1xf32>
    %28 = arith.addf %26, %27 : vector<8x1xf32>
    %29 = math.log %28 : vector<8x1xf32>
    %cst_17 = arith.constant 0.000000e+00 : f32
    %30 = vector.broadcast %cst_17 : f32 to vector<8x8xf32>
    %31 = arith.cmpf ogt, %9, %30 : vector<8x8xf32>
    %cst_18 = arith.constant -18.420681 : f32
    %32 = vector.shape_cast %29 : vector<8x1xf32> to vector<8x1xf32>
    %33 = vector.broadcast %32 : vector<8x1xf32> to vector<8x8xf32>
    %34 = vector.broadcast %cst_18 : f32 to vector<8x8xf32>
    %35 = arith.select %31, %33, %34 : vector<8x8xi1>, vector<8x8xf32>
    %cst_19 = arith.constant dense<0xFF800000> : vector<8xf32>
    %36 = vector.multi_reduction <maximumf>, %17, %cst_19 [1] : vector<8x8xf32> to vector<8xf32>
    %37 = vector.shape_cast %36 : vector<8xf32> to vector<8x1xf32>
    %38 = vector.broadcast %37 : vector<8x1xf32> to vector<8x8xf32>
    %39 = arith.subf %17, %38 : vector<8x8xf32>
    %40 = math.exp %39 : vector<8x8xf32>
    %cst_20 = arith.constant dense<0.000000e+00> : vector<8xf32>
    %41 = vector.multi_reduction <add>, %40, %cst_20 [1] : vector<8x8xf32> to vector<8xf32>
    %42 = vector.shape_cast %41 : vector<8xf32> to vector<8x1xf32>
    %cst_21 = arith.constant 1.000000e+00 : f32
    %43 = vector.broadcast %cst_21 : f32 to vector<8x1xf32>
    %44 = arith.divf %43, %42 : vector<8x1xf32>
    %45 = vector.broadcast %44 : vector<8x1xf32> to vector<8x8xf32>
    %46 = arith.mulf %40, %45 : vector<8x8xf32>
    %47 = math.log %42 : vector<8x1xf32>
    %48 = vector.broadcast %47 : vector<8x1xf32> to vector<8x8xf32>
    %49 = arith.subf %39, %48 : vector<8x8xf32>
    %cst_22 = arith.constant dense<0xFF800000> : vector<8xf32>
    %50 = vector.multi_reduction <maximumf>, %21, %cst_22 [1] : vector<8x8xf32> to vector<8xf32>
    %51 = vector.shape_cast %50 : vector<8xf32> to vector<8x1xf32>
    %52 = vector.broadcast %51 : vector<8x1xf32> to vector<8x8xf32>
    %53 = arith.subf %21, %52 : vector<8x8xf32>
    %54 = math.exp %53 : vector<8x8xf32>
    %cst_23 = arith.constant dense<0.000000e+00> : vector<8xf32>
    %55 = vector.multi_reduction <add>, %54, %cst_23 [1] : vector<8x8xf32> to vector<8xf32>
    %56 = vector.shape_cast %55 : vector<8xf32> to vector<8x1xf32>
    %cst_24 = arith.constant 1.000000e+00 : f32
    %57 = vector.broadcast %cst_24 : f32 to vector<8x1xf32>
    %58 = arith.divf %57, %56 : vector<8x1xf32>
    %59 = vector.broadcast %58 : vector<8x1xf32> to vector<8x8xf32>
    %60 = arith.mulf %54, %59 : vector<8x8xf32>
    %61 = math.log %56 : vector<8x1xf32>
    %62 = vector.broadcast %61 : vector<8x1xf32> to vector<8x8xf32>
    %63 = arith.subf %53, %62 : vector<8x8xf32>
    %64 = arith.subf %49, %35 : vector<8x8xf32>
    %65 = arith.mulf %46, %64 : vector<8x8xf32>
    %66 = arith.subf %63, %35 : vector<8x8xf32>
    %67 = arith.mulf %60, %66 : vector<8x8xf32>
    %68 = arith.addf %65, %67 : vector<8x8xf32>
    %69 = vector.shape_cast %68 : vector<8x8xf32> to vector<1x8x8xf32>
    %cst_25 = arith.constant dense<0.000000e+00> : vector<1xf32>
    %70 = vector.multi_reduction <add>, %69, %cst_25 [1, 2] : vector<1x8x8xf32> to vector<1xf32>
    %71 = vector.shape_cast %70 : vector<1xf32> to vector<1x1x1xf32>
    %72 = vector.extract %71[0, 0, 0] : f32 from vector<1x1x1xf32>
    %73 = vector.shape_cast %12 : vector<8x8xf32> to vector<1x8x8xf32>
    %cst_26 = arith.constant dense<0.000000e+00> : vector<1xf32>
    %74 = vector.multi_reduction <add>, %73, %cst_26 [1, 2] : vector<1x8x8xf32> to vector<1xf32>
    %75 = vector.shape_cast %74 : vector<1xf32> to vector<1x1x1xf32>
    %76 = vector.extract %75[0, 0, 0] : f32 from vector<1x1x1xf32>
    %77 = arith.mulf %12, %9 : vector<8x8xf32>
    %78 = vector.shape_cast %77 : vector<8x8xf32> to vector<1x8x8xf32>
    %cst_27 = arith.constant dense<0.000000e+00> : vector<1xf32>
    %79 = vector.multi_reduction <add>, %78, %cst_27 [1, 2] : vector<1x8x8xf32> to vector<1xf32>
    %80 = vector.shape_cast %79 : vector<1xf32> to vector<1x1x1xf32>
    %81 = vector.extract %80[0, 0, 0] : f32 from vector<1x1x1xf32>
    %82 = vector.shape_cast %23 : vector<8x1xf32> to vector<1x8x1xf32>
    %cst_28 = arith.constant dense<0.000000e+00> : vector<1xf32>
    %83 = vector.multi_reduction <add>, %82, %cst_28 [1, 2] : vector<1x8x1xf32> to vector<1xf32>
    %84 = vector.shape_cast %83 : vector<1xf32> to vector<1x1x1xf32>
    %85 = vector.extract %84[0, 0, 0] : f32 from vector<1x1x1xf32>
    %86 = tpu.iota {dimensions = array<i32: 2>} : vector<1x8x128xi32>
    %c0_i32 = arith.constant 0 : i32
    %87 = vector.broadcast %c0_i32 : i32 to vector<1x8x128xi32>
    %88 = arith.cmpi eq, %86, %87 : vector<1x8x128xi32>
    %cst_29 = arith.constant 0.000000e+00 : f32
    %89 = vector.broadcast %72 : f32 to vector<1x8x128xf32>
    %90 = vector.broadcast %cst_29 : f32 to vector<1x8x128xf32>
    %91 = arith.select %88, %89, %90 : vector<1x8x128xi1>, vector<1x8x128xf32>
    %c1_i32 = arith.constant 1 : i32
    %92 = vector.broadcast %c1_i32 : i32 to vector<1x8x128xi32>
    %93 = arith.cmpi eq, %86, %92 : vector<1x8x128xi32>
    %cst_30 = arith.constant 0.000000e+00 : f32
    %94 = vector.broadcast %76 : f32 to vector<1x8x128xf32>
    %95 = vector.broadcast %cst_30 : f32 to vector<1x8x128xf32>
    %96 = arith.select %93, %94, %95 : vector<1x8x128xi1>, vector<1x8x128xf32>
    %97 = arith.addf %91, %96 : vector<1x8x128xf32>
    %c2_i32 = arith.constant 2 : i32
    %98 = vector.broadcast %c2_i32 : i32 to vector<1x8x128xi32>
    %99 = arith.cmpi eq, %86, %98 : vector<1x8x128xi32>
    %cst_31 = arith.constant 0.000000e+00 : f32
    %100 = vector.broadcast %81 : f32 to vector<1x8x128xf32>
    %101 = vector.broadcast %cst_31 : f32 to vector<1x8x128xf32>
    %102 = arith.select %99, %100, %101 : vector<1x8x128xi1>, vector<1x8x128xf32>
    %103 = arith.addf %97, %102 : vector<1x8x128xf32>
    %c3_i32 = arith.constant 3 : i32
    %104 = vector.broadcast %c3_i32 : i32 to vector<1x8x128xi32>
    %105 = arith.cmpi eq, %86, %104 : vector<1x8x128xi32>
    %cst_32 = arith.constant 0.000000e+00 : f32
    %106 = vector.broadcast %85 : f32 to vector<1x8x128xf32>
    %107 = vector.broadcast %cst_32 : f32 to vector<1x8x128xf32>
    %108 = arith.select %105, %106, %107 : vector<1x8x128xi1>, vector<1x8x128xf32>
    %109 = arith.addf %103, %108 : vector<1x8x128xf32>
    %c0_33 = arith.constant 0 : index
    %c0_34 = arith.constant 0 : index
    %c0_35 = arith.constant 0 : index
    %110 = vector.load %arg6[%c0_33, %c0_34, %c0_35] : memref<1x8x128xf32, #tpu.memory_space<vmem>>, vector<1x8x128xf32>
    tpu.vector_store %arg6[%c0_33, %c0_34, %c0_35], %109 {strides = array<i32>} : memref<1x8x128xf32, #tpu.memory_space<vmem>>, vector<1x8x128xf32>,
    return
  }
  func.func @transform_0(%arg0: i32) -> (i32, i32) {
    %c0_i32 = arith.constant 0 : i32
    %c0_i32_0 = arith.constant 0 : i32
    %c0_i32_1 = arith.constant 0 : i32
    return %c0_i32, %c0_i32_0 : i32, i32
  }
  func.func @transform_1(%arg0: i32) -> (i32, i32) {
    %c0_i32 = arith.constant 0 : i32
    %c0_i32_0 = arith.constant 0 : i32
    %c0_i32_1 = arith.constant 0 : i32
    return %c0_i32, %c0_i32_0 : i32, i32
  }
  func.func @transform_2(%arg0: i32) -> (i32, i32) {
    %c0_i32 = arith.constant 0 : i32
    %c0_i32_0 = arith.constant 0 : i32
    return %arg0, %c0_i32 : i32, i32
  }
  func.func @transform_3(%arg0: i32) -> (i32, i32) {
    %c0_i32 = arith.constant 0 : i32
    %c0_i32_0 = arith.constant 0 : i32
    return %arg0, %c0_i32 : i32, i32
  }
  func.func @transform_4(%arg0: i32) -> (i32, i32) {
    %c0_i32 = arith.constant 0 : i32
    %c0_i32_0 = arith.constant 0 : i32
    return %arg0, %c0_i32 : i32, i32
  }
  func.func @transform_5(%arg0: i32) -> (i32, i32, i32) {
    %c0_i32 = arith.constant 0 : i32
    %c0_i32_0 = arith.constant 0 : i32
    %c0_i32_1 = arith.constant 0 : i32
    return %arg0, %c0_i32, %c0_i32_0 : i32, i32, i32
  }
}

</mosaic_0001>

<bundles_post_ra>
// kernel: tpu_custom_call.1
= control target key start
LH: loop header
LB: loop body
LE: loop exit
PB: predicated region body
PF: predicated region fallthrough
CT: control target
= control target key end

     0   :  { %vm33_vm0 = vcmask 261120   ;;  %v389_v2 = vmov 0.0   ;;  %s453_s0 = inlined_call_operand.vmem [shape: f32[8,32], index: 0, kind: input, shape index: {}]   ;;  %s454_s1 = inlined_call_operand.vmem [shape: f32[8,32], index: 1, kind: input, shape index: {}]   ;;  %s455_s2 = inlined_call_operand.vmem [shape: f32[8,1], index: 2, kind: input, shape index: {}]   ;;  %s456_s3 = inlined_call_operand.vmem [shape: f32[8,1], index: 3, kind: input, shape index: {}]   ;;  %s457_s4 = inlined_call_operand.vmem [shape: s8[8,8], index: 4, kind: input, shape index: {}]   ;;  %s458_s5 = inlined_call_operand.hbm [shape: f32[1,8,128], index: 5, kind: output, shape index: {}]  }
   0x1   :  { %v23_v0 = vld [vmem:[%s454_s1] sm:$0xff]  ;;  %328 = vmatprep.subr.mxu0 %v389_v2  ;;  %333 = vmatprep.subr.mxu1 %v389_v2 }
   0x2   :  { %v22_v1 = vld [vmem:[%s453_s0] sm:$0xff] }
   0x3   :  { %v31_v3 = vld [vmem:[%s455_s2] sm:$0xff] }
   0x4   :  { %10 = vsyncpa [#allocation3], 0  ;;  %329 = vmatpush3.xpose.msk.msra.mxu0 %vm33_vm0, %v23_v0  ;;  %334 = vmatpush3.xpose.msk.msra.mxu1 %vm33_vm0, %v22_v1  ;;  %v186_v4 = vmul.f32 50.0, %v31_v3  ;;  %vm390_vm1 = vmmov 0   ;;  %v32_v5 = vld [vmem:[%s456_s3] sm:$0xff]  ;;  %v391_v6 = vmov 0  }
   0x5   :  { %330 = vmatprep.mubr.msk.f32.mxu0 %vm390_vm1, %v389_v2  ;;  %335 = vmatprep.mubr.msk.f32.mxu1 %vm390_vm1, %v389_v2  ;;  %v193_v7 = vmul.f32 50.0, %v32_v5  ;;  %vm200_vm2 = vcmask 64512   ;;  %v28_v17 = vld [vmem:[%s457_s4] sm:$0x3]  ;;  %vm277_vm4 = vcmask 7168   ;;  %s392_s27 = smov [#allocation2]  }
   0x6   :  { %350 = vset.pattern.permute.xlu0 %v391_v6  ;;  %v29_v19 = vunpack.c.0.s8 %v28_v17  ;;  %s312_s28 = sshll.u32 %s392_s27, 4  ;;  %s313_s28 = int_to_ptr.vmem [resolvable:$true] %s312_s28 }
   0x7   :  { %331 = vmatmul.mubr.msk.f32.vlgmr.msra.gmra.mxu0 %vm33_vm0, %v22_v1  ;;  %336 = vmatmul.mubr.msk.f32.vlgmr.msra.gmra.mxu1 %vm33_vm0, %v23_v0  ;;  %s367_s29 = scalar_lea.vmem %s313_s28, 128  ;;  %p372_p1 = scmp.lt.s32.totalorder %s313_s28, %s313_s28 }
   0x8   :  { %189 = vperm.xlu0 %350, %v186_v4   ;;  %v30_v20 = vcvt.s32.f32 %v29_v19  ;;  %p368_p0 = scmp.ne.s32.totalorder %s313_s28, %s367_s29  ;;  %p373_p2 = scmp.lt.s32.totalorder %s367_s29, %s367_s29 }
   0xa   :  { %v201_v21 = vsel %vm200_vm2, %v30_v20, 0.0  ;;  %vm209_vm3 = vcmp.gt.f32.partialorder %v30_v20, 0.0  ;;  %p374_p3 = por %p373_p2, %p372_p1 }
   0xc   :  { %196 = vperm.xlu0 %350, %v193_v7   ;;  %p375_p4 = pnand %p374_p3, %p368_p0 }
  0x2b   :  { %202 = vadd.xlane.f32.xlu0 %v201_v21 }
  0x83   :  { %v190_v8 = vpop.permute.xlu0 %189 }
  0x87   :  { %v197_v9 = vpop.permute.xlu0 %196 }
  0xb4   :  { %v203_v35 = vpop.xlane.xlu0 %202 }
  0xb5   :  { %v204_v36 = vmax.f32 %v203_v35, 1e-24  ;;  %v278_v60 = vsel %vm277_vm4, %v203_v35, 0.0 }
  0xc7   :  { %v106_v10 = vpop.f32.mrf.mxu0  ;;  %v182_v11 = vpop.f32.mrf.mxu1 }
  0xc8   :  { %v192_v12 = vmul.f32 %v190_v8, %v106_v10  ;;  %v199_v15 = vmul.f32 %v197_v9, %v182_v11  ;;  %v256_v32 = vsel %vm200_vm2, %v106_v10, 0.0  ;;  %v266_v33 = vmul.f32 %v106_v10, %v30_v20 }
  0xc9   :  { %v332_v13 = vpop.f32.mrf.mxu0  ;;  %v337_v14 = vpop.f32.mrf.mxu1 }
  0xca   :  { %v211_v16 = vsel %vm200_vm2, %v192_v12, -inf  ;;  %v226_v18 = vsel %vm200_vm2, %v199_v15, -inf  ;;  %v267_v34 = vsel %vm200_vm2, %v266_v33, 0.0 }
  0xcb   :  { %212 = vmax.xlane.f32.xlu1 %v211_v16 }
  0xcf   :  { %227 = vmax.xlane.f32.xlu1 %v226_v18 }
 0x154   :  { %v213_v22 = vpop.xlane.xlu1 %212 }
 0x155   :  { %v214_v23 = vsub.f32 %v192_v12, %v213_v22 }
 0x157   :  { %v215_v24 = vmul.f32 1.442695, %v214_v23 }
 0x158   :  { %v228_v25 = vpop.xlane.xlu1 %227 }
 0x159   :  { %351 = vpow2.f32 %v215_v24  ;;  %v229_v26 = vsub.f32 %v199_v15, %v228_v25  ;;  %v288_v25 = vlaneseq }
 0x15b   :  { %v230_v27 = vmul.f32 1.442695, %v229_v26 }
 0x15d   :  { %353 = vpow2.f32 %v230_v27 }
 0x15e   :  { %355 = vrsqrt.f32 %v204_v36 }
 0x166   :  { %v352_v28 = vpop.eup %351 }
 0x167   :  { %v217_v29 = vsel %vm200_vm2, %v352_v28, 0.0 }
 0x168   :  { %218 = vadd.xlane.f32.xlu1 %v217_v29 }
 0x16a   :  { %v354_v30 = vpop.eup %353 }
 0x16b   :  { %v232_v31 = vsel %vm200_vm2, %v354_v30, 0.0  ;;  %v356_v37 = vpop.eup %355 }
 0x16c   :  { %233 = vadd.xlane.f32.xlu1 %v232_v31  ;;  %v206_v38 = vadd.f32 1e-08, %v356_v37 }
 0x16e   :  { %357 = vlog2.f32 %v206_v38 }
 0x170   :  { %257 = vadd.xlane.f32.xlu1 %v256_v32 }
 0x174   :  { %268 = vadd.xlane.f32.xlu1 %v267_v34 }
 0x17b   :  { %v358_v41 = vpop.eup %357 }
 0x17c   :  { %v208_v43 = vmul.f32 0.6931472, %v358_v41 }
 0x17e   :  { %v210_v47 = vsel %vm209_vm3, %v208_v43, -18.420681 }
 0x1f1   :  { %v219_v39 = vpop.xlane.xlu1 %218 }
 0x1f2   :  { %359 = vlog2.f32 %v219_v39 }
 0x1f5   :  { %v234_v40 = vpop.xlane.xlu1 %233 }
 0x1f6   :  { %361 = vlog2.f32 %v234_v40 }
 0x1f7   :  { %363 = vrcp.f32 %v219_v39 }
 0x1f8   :  { %365 = vrcp.f32 %v234_v40 }
 0x1f9   :  { %v258_v61 = vpop.xlane.xlu1 %257 }
 0x1fa   :  { %v259_v63 = vrot.slane %v258_v61, 4 }
 0x1fc   :  { %v260_v1 = vadd.f32 %v259_v63, %v258_v61 }
 0x1fd   :  { %v269_v62 = vpop.xlane.xlu1 %268 }
 0x1fe   :  { %v270_v0 = vrot.slane %v269_v62, 4  ;;  %v261_v3 = vrot.slane %v260_v1, 2 }
 0x1ff   :  { %v360_v42 = vpop.eup %359 }
 0x200   :  { %v224_v44 = vmul.f32 0.6931472, %v360_v42  ;;  %v271_v2 = vadd.f32 %v270_v0, %v269_v62  ;;  %v262_v9 = vadd.f32 %v261_v3, %v260_v1 }
 0x202   :  { %v225_v45 = vsub.f32 %v214_v23, %v224_v44  ;;  %v272_v5 = vrot.slane %v271_v2, 2  ;;  %v263_v15 = vrot.slane %v262_v9, 1 }
 0x203   :  { %v362_v46 = vpop.eup %361 }
 0x204   :  { %v364_v48 = vpop.eup %363  ;;  %v239_v49 = vmul.f32 0.6931472, %v362_v46  ;;  %v241_v52 = vsub.f32 %v225_v45, %v210_v47  ;;  %v273_v12 = vadd.f32 %v272_v5, %v271_v2  ;;  %v264_v21 = vadd.f32 %v263_v15, %v262_v9 }
 0x205   :  { %v366_v50 = vpop.eup %365  ;;  %v222_v53 = vmul.f32 %v364_v48, %v352_v28 }
 0x206   :  { %v240_v51 = vsub.f32 %v229_v26, %v239_v49  ;;  %v237_v54 = vmul.f32 %v366_v50, %v354_v30  ;;  %v274_v18 = vrot.slane %v273_v12, 1  ;;  %v289_v26 = vand.u32 127, %v288_v25 }
 0x207   :  { %v242_v56 = vmul.f32 %v241_v52, %v222_v53 }
 0x208   :  { %v243_v55 = vsub.f32 %v240_v51, %v210_v47  ;;  %v275_v22 = vadd.f32 %v274_v18, %v273_v12  ;;  %vm290_vm5 = vcmp.eq.s32.totalorder %v289_v26, 0  ;;  %vm293_vm6 = vcmp.eq.s32.totalorder %v289_v26, 1 }
 0x209   :  { %vm297_vm7 = vcmp.eq.s32.totalorder %v289_v26, 2  ;;  %vm301_vm8 = vcmp.eq.s32.totalorder %v289_v26, 3 }
 0x20a   :  { %v244_v57 = vmul.f32 %v243_v55, %v237_v54 }
 0x20c   :  { %v245_v58 = vadd.f32 %v244_v57, %v242_v56 }
 0x20e   :  { %v246_v59 = vsel %vm200_vm2, %v245_v58, 0.0 }
 0x20f   :  { %247 = vadd.xlane.f32.xlu1 %v246_v59 }
 0x213   :  { %279 = vadd.xlane.f32.xlu1 %v278_v60 }
 0x298   :  { %v248_v4 = vpop.xlane.xlu1 %247 }
 0x299   :  { %v249_v6 = vrot.slane %v248_v4, 4 }
 0x29b   :  { %v250_v7 = vadd.f32 %v249_v6, %v248_v4 }
 0x29c   :  { %v280_v8 = vpop.xlane.xlu1 %279 }
 0x29d   :  { %v251_v10 = vrot.slane %v250_v7, 2  ;;  %v281_v11 = vrot.slane %v280_v8, 4 }
 0x29f   :  { %v282_v13 = vadd.f32 %v281_v11, %v280_v8  ;;  %v252_v14 = vadd.f32 %v251_v10, %v250_v7 }
 0x2a1   :  { %v283_v16 = vrot.slane %v282_v13, 2  ;;  %v253_v17 = vrot.slane %v252_v14, 1 }
 0x2a3   :  { %v284_v19 = vadd.f32 %v283_v16, %v282_v13  ;;  %v254_v20 = vadd.f32 %v253_v17, %v252_v14 }
 0x2a5   :  { %338 = vpush %v254_v20  ;;  %v285_v23 = vrot.slane %v284_v19, 1 }
 0x2a6   :  { %340 = vpush %v264_v21 }
 0x2a7   :  { %342 = vpush %v275_v22  ;;  %v286_v24 = vadd.f32 %v285_v23, %v284_v19 }
 0x2a9   :  { %344 = vpush %v286_v24 }
 0x2d6   :  { %s339_s3 = spop %338 }
 0x2d7   :  { %v291_v27 = vstv %s339_s3  ;;  %s341_s4 = spop %340 }
 0x2d8   :  { %v292_v28 = vsel %vm290_vm5, %v291_v27, 0.0  ;;  %v294_v29 = vstv %s341_s4  ;;  %s343_s25 = spop %342 }
 0x2d9   :  { %v295_v30 = vsel %vm293_vm6, %v294_v29, 0.0  ;;  %v298_v31 = vstv %s343_s25 }
 0x2da   :  { %v296_v32 = vadd.f32 %v295_v30, %v292_v28  ;;  %s345_s26 = spop %344  ;;  %v299_v33 = vsel %vm297_vm7, %v298_v31, 0.0 }
 0x2db   :  { %v302_v34 = vstv %s345_s26 }
 0x2dc   :  { %v300_v35 = vadd.f32 %v299_v33, %v296_v32  ;;  %v303_v36 = vsel %vm301_vm8, %v302_v34, 0.0 }
 0x2de   :  { %v304_v37 = vadd.f32 %v303_v36, %v300_v35 }
 0x2e0   :  { %305 = vst [vmem:[#allocation2] sm:$0xff] %v304_v37 }
 0x2e1   :  { %378 = shalt.err (!%p375_p4)
}
 0x2e2   :  { %315 = dma.vmem_to_hbm [thread:$0]  %s313_s28, 128, %s458_s5, [#allocation3]  }
 0x2e3   :  { %387 = dma.done.wait [#allocation3], 128  }
 0x2e4   :  { %388 = vsyncadd [#allocation3], 4294967168 }
 0x2e5   :  { %319 = vsyncpa [#allocation3], 1 }

</bundles_post_ra>
